<compile_context>
chip_gen: v6e
topology: v6e:2x2x1
jax: 0.10.0
libtpu: 0.0.40
codegen_flags: <defaults>
</compile_context>

<pallas_src>
import jax
import jax.numpy as jnp
from jax.experimental import pallas as pl
from jax.experimental.pallas import tpu as pltpu


def encoder_kernel(x_ref, w1a_ref, w1b_ref, b1_ref, w2_ref, b2_ref,
                   zloc_ref, zscale_ref):
    """One (2, TILE_N) column block of samples.

    x_ref:      (2, TILE_N)   input features, samples lane-dense
    w1a_ref:    (H, 1)        fc1 weight column for feature 0
    w1b_ref:    (H, 1)        fc1 weight column for feature 1
    b1_ref:     (H, 1)        fc1 bias
    w2_ref:     (2Z, H)       fused fc21|fc22 weight (transposed)
    b2_ref:     (2Z, 1)       fused fc21|fc22 bias
    zloc_ref:   (Z, TILE_N)
    zscale_ref: (Z, TILE_N)
    """
    zdim = zloc_ref.shape[0]

    # --- fc1 as VPU broadcast-FMAs (K=2 would waste >98% of the MXU) -------
    x0 = x_ref[0:1, :]                                   # (1, TILE_N)
    x1 = x_ref[1:2, :]                                   # (1, TILE_N)
    pre = w1a_ref[...] * x0 + w1b_ref[...] * x1 + b1_ref[...]   # (H, TILE_N)

    # --- Softplus (beta=1, threshold=20): 1 exp + 1 log1p per element ------
    e = jnp.exp(jnp.minimum(pre, 20.0))                  # clamp avoids overflow
    h = jnp.where(pre > 20.0, pre, jnp.log1p(e))         # (H, TILE_N)

    # --- fused fc21|fc22: single MXU matmul, lane-dense result -------------
    z = jnp.dot(w2_ref[...], h, preferred_element_type=jnp.float32) + b2_ref[...]

    zloc_ref[...] = z[:zdim, :]                          # fc21(h)
    zscale_ref[...] = jnp.exp(z[zdim:, :])               # exp(fc22(h))


def encoder_forward(x, params, *, max_tile_n=512):
    """x: any shape with total elements divisible by 2 (flattened to (-1, 2))."""
    w1, b1, w21, b21, w22, b22 = params                  # (in,out) / (1,out) layout
    hdim = w1.shape[1]
    zdim = w21.shape[1]

    # Flatten to (N, 2) samples, then transpose so N is the lane axis.
    x2 = x.reshape(-1, 2).astype(jnp.float32)
    n = x2.shape[0]

    # Lane-dense tiling: TILE_N multiple of 128; pad N up to a tile multiple.
    tile_n = min(max_tile_n, ((n + 127) // 128) * 128)
    n_pad = pl.cdiv(n, tile_n) * tile_n
    x_t = jnp.zeros((2, n_pad), jnp.float32).at[:, :n].set(x2.T)

    # One-time parameter layout plumbing (outside the kernel).
    w1a = w1[0].reshape(hdim, 1)                          # (H, 1)
    w1b = w1[1].reshape(hdim, 1)                          # (H, 1)
    b1_t = b1.reshape(hdim, 1)                            # (H, 1)
    w2_t = jnp.concatenate([w21, w22], axis=1).T          # (2Z, H)
    b2_t = jnp.concatenate([b21, b22], axis=1).reshape(2 * zdim, 1)

    grid = (n_pad // tile_n,)
    const = lambda shape: pl.BlockSpec(shape, lambda i: (0, 0))

    zloc_t, zscale_t = pl.pallas_call(
        encoder_kernel,
        out_shape=(
            jax.ShapeDtypeStruct((zdim, n_pad), jnp.float32),
            jax.ShapeDtypeStruct((zdim, n_pad), jnp.float32),
        ),
        grid=grid,
        in_specs=[
            pl.BlockSpec((2, tile_n), lambda i: (0, i)),  # x (tiled over N)
            const((hdim, 1)),                             # w1 col 0 (resident)
            const((hdim, 1)),                             # w1 col 1
            const((hdim, 1)),                             # b1
            const((2 * zdim, hdim)),                      # fused w21|w22
            const((2 * zdim, 1)),                         # fused b21|b22
        ],
        out_specs=(
            pl.BlockSpec((zdim, tile_n), lambda i: (0, i)),
            pl.BlockSpec((zdim, tile_n), lambda i: (0, i)),
        ),
        compiler_params=pltpu.CompilerParams(
            dimension_semantics=("parallel",),            # 2x on v7x megacore
            vmem_limit_bytes=32 * 1024 * 1024,            # safe on 64 MiB v7x VMEM
        ),
    )(x_t, w1a, w1b, b1_t, w2_t, b2_t)

    # Drop padding and return samples-major (N, Z) like the PyTorch module.
    return zloc_t[:, :n].T, zscale_t[:, :n].T


def init_params(key, z_dim, hidden_dim):
    """Deterministic PyTorch-Linear-style init (U[-1/sqrt(fan_in), 1/sqrt(fan_in)])."""
    ks = jax.random.split(key, 6)

    def lin(kw, kb, fan_in, fan_out):
        bound = 1.0 / jnp.sqrt(fan_in)
        w = jax.random.uniform(kw, (fan_in, fan_out), jnp.float32, -bound, bound)
        b = jax.random.uniform(kb, (1, fan_out), jnp.float32, -bound, bound)
        return w, b

    w1, b1 = lin(ks[0], ks[1], 2, hidden_dim)
    w21, b21 = lin(ks[2], ks[3], hidden_dim, z_dim)
    w22, b22 = lin(ks[4], ks[5], hidden_dim, z_dim)
    return (w1, b1, w21, b21, w22, b22)


def reference_forward(x, params):
    """Pure-JAX reference mirroring the PyTorch forward."""
    w1, b1, w21, b21, w22, b22 = params
    hp = jax.lax.Precision.HIGHEST
    x2 = x.reshape(-1, 2).astype(jnp.float32)
    pre = jnp.dot(x2, w1, precision=hp) + b1
    h = jnp.where(pre > 20.0, pre, jnp.log1p(jnp.exp(jnp.minimum(pre, 20.0))))
    z_loc = jnp.dot(h, w21, precision=hp) + b21
    z_scale = jnp.exp(jnp.dot(h, w22, precision=hp) + b22)
    return z_loc, z_scale


if __name__ == "__main__":
    z_dim, hidden_dim = 8, 32
    key = jax.random.PRNGKey(0)
    kx, kp = jax.random.split(key)

    # 8*16*16 = 2048 elements -> flatten to (-1, 2) gives N = 1024 samples
    # -> TILE_N = 512, grid = (2,): exercises the pipelined N grid.
    x = jax.random.normal(kx, (8, 16, 16), jnp.float32)
    params = init_params(kp, z_dim, hidden_dim)

    z_loc, z_scale = encoder_forward(x, params)
    jax.block_until_ready((z_loc, z_scale))

    ref_loc, ref_scale = reference_forward(x, params)
    n = x.size // 2
    assert z_loc.shape == (n, z_dim) and z_scale.shape == (n, z_dim)
    assert jnp.allclose(z_loc, ref_loc, atol=1e-4, rtol=1e-4)
    assert jnp.allclose(z_scale, ref_scale, atol=1e-4, rtol=1e-4)

    print("KERNEL_OK")
</pallas_src>

<mosaic_0001>
module attributes {stable_mosaic.version = 11 : i64} {
  func.func @encoder_kernel(%arg0: i32, %arg1: memref<2x512xf32, #tpu.memory_space<vmem>>, %arg2: memref<32x1xf32, #tpu.memory_space<vmem>>, %arg3: memref<32x1xf32, #tpu.memory_space<vmem>>, %arg4: memref<32x1xf32, #tpu.memory_space<vmem>>, %arg5: memref<16x32xf32, #tpu.memory_space<vmem>>, %arg6: memref<16x1xf32, #tpu.memory_space<vmem>>, %arg7: memref<8x512xf32, #tpu.memory_space<vmem>>, %arg8: memref<8x512xf32, #tpu.memory_space<vmem>>) attributes {dimension_semantics = [#tpu.dimension_semantics<parallel>], iteration_bounds = array<i64: 2>, scalar_prefetch = 0 : i64, scratch_operands = 0 : i64, tpu.core_type = #tpu.core_type<tc>, window_params = [{transform_indices = @transform_0, window_bounds = array<i64: 2, 512>}, {pipeline_mode = #tpu.pipeline_mode<synchronous>, transform_indices = @transform_1, window_bounds = array<i64: 32, 1>}, {pipeline_mode = #tpu.pipeline_mode<synchronous>, transform_indices = @transform_2, window_bounds = array<i64: 32, 1>}, {pipeline_mode = #tpu.pipeline_mode<synchronous>, transform_indices = @transform_3, window_bounds = array<i64: 32, 1>}, {pipeline_mode = #tpu.pipeline_mode<synchronous>, transform_indices = @transform_4, window_bounds = array<i64: 16, 32>}, {pipeline_mode = #tpu.pipeline_mode<synchronous>, transform_indices = @transform_5, window_bounds = array<i64: 16, 1>}, {transform_indices = @transform_6, window_bounds = array<i64: 8, 512>}, {transform_indices = @transform_7, window_bounds = array<i64: 8, 512>}]} {
    %c0 = arith.constant 0 : index
    %c0_0 = arith.constant 0 : index
    %0 = vector.load %arg1[%c0, %c0_0] : memref<2x512xf32, #tpu.memory_space<vmem>>, vector<1x512xf32>
    %c1 = arith.constant 1 : index
    %c0_1 = arith.constant 0 : index
    %1 = vector.load %arg1[%c1, %c0_1] : memref<2x512xf32, #tpu.memory_space<vmem>>, vector<1x512xf32>
    %c0_2 = arith.constant 0 : index
    %c0_3 = arith.constant 0 : index
    %2 = vector.load %arg2[%c0_2, %c0_3] : memref<32x1xf32, #tpu.memory_space<vmem>>, vector<32x1xf32>
    %3 = vector.broadcast %2 : vector<32x1xf32> to vector<32x512xf32>
    %4 = vector.broadcast %0 : vector<1x512xf32> to vector<32x512xf32>
    %5 = arith.mulf %3, %4 : vector<32x512xf32>
    %c0_4 = arith.constant 0 : index
    %c0_5 = arith.constant 0 : index
    %6 = vector.load %arg3[%c0_4, %c0_5] : memref<32x1xf32, #tpu.memory_space<vmem>>, vector<32x1xf32>
    %7 = vector.broadcast %6 : vector<32x1xf32> to vector<32x512xf32>
    %8 = vector.broadcast %1 : vector<1x512xf32> to vector<32x512xf32>
    %9 = arith.mulf %7, %8 : vector<32x512xf32>
    %10 = arith.addf %5, %9 : vector<32x512xf32>
    %c0_6 = arith.constant 0 : index
    %c0_7 = arith.constant 0 : index
    %11 = vector.load %arg4[%c0_6, %c0_7] : memref<32x1xf32, #tpu.memory_space<vmem>>, vector<32x1xf32>
    %12 = vector.broadcast %11 : vector<32x1xf32> to vector<32x512xf32>
    %13 = arith.addf %10, %12 : vector<32x512xf32>
    %cst = arith.constant 2.000000e+01 : f32
    %14 = vector.broadcast %cst : f32 to vector<32x512xf32>
    %15 = arith.minimumf %13, %14 : vector<32x512xf32>
    %16 = math.exp %15 : vector<32x512xf32>
    %cst_8 = arith.constant 2.000000e+01 : f32
    %17 = vector.broadcast %cst_8 : f32 to vector<32x512xf32>
    %18 = arith.cmpf ogt, %13, %17 : vector<32x512xf32>
    %19 = math.log1p %16 : vector<32x512xf32>
    %20 = arith.select %18, %13, %19 : vector<32x512xi1>, vector<32x512xf32>
    %c0_9 = arith.constant 0 : index
    %c0_10 = arith.constant 0 : index
    %21 = vector.load %arg5[%c0_9, %c0_10] : memref<16x32xf32, #tpu.memory_space<vmem>>, vector<16x32xf32>
    %cst_11 = arith.constant dense<0.000000e+00> : vector<16x512xf32>
    %22 = tpu.matmul %21, %20, %cst_11 {dimension_numbers = #tpu.dot_dimension_numbers<[1], [0], [0], [1], [0, 0, 1, 1], [], []>} : vector<16x32xf32>, vector<32x512xf32>, vector<16x512xf32> -> vector<16x512xf32>
    %c0_12 = arith.constant 0 : index
    %c0_13 = arith.constant 0 : index
    %23 = vector.load %arg6[%c0_12, %c0_13] : memref<16x1xf32, #tpu.memory_space<vmem>>, vector<16x1xf32>
    %24 = vector.broadcast %23 : vector<16x1xf32> to vector<16x512xf32>
    %25 = arith.addf %22, %24 : vector<16x512xf32>
    %26 = vector.extract_strided_slice %25 {offsets = [0, 0], sizes = [8, 512], strides = [1, 1]} : vector<16x512xf32> to vector<8x512xf32>
    %c0_14 = arith.constant 0 : index
    %c0_15 = arith.constant 0 : index
    %27 = vector.load %arg7[%c0_14, %c0_15] : memref<8x512xf32, #tpu.memory_space<vmem>>, vector<8x512xf32>
    tpu.vector_store %arg7[%c0_14, %c0_15], %26 {strides = array<i32>} : memref<8x512xf32, #tpu.memory_space<vmem>>, vector<8x512xf32>,
    %28 = vector.extract_strided_slice %25 {offsets = [8, 0], sizes = [8, 512], strides = [1, 1]} : vector<16x512xf32> to vector<8x512xf32>
    %29 = math.exp %28 : vector<8x512xf32>
    %c0_16 = arith.constant 0 : index
    %c0_17 = arith.constant 0 : index
    %30 = vector.load %arg8[%c0_16, %c0_17] : memref<8x512xf32, #tpu.memory_space<vmem>>, vector<8x512xf32>
    tpu.vector_store %arg8[%c0_16, %c0_17], %29 {strides = array<i32>} : memref<8x512xf32, #tpu.memory_space<vmem>>, vector<8x512xf32>,
    return
  }
  func.func @transform_0(%arg0: i32) -> (i32, i32) {
    %c0_i32 = arith.constant 0 : i32
    %c0_i32_0 = arith.constant 0 : i32
    return %c0_i32, %arg0 : i32, i32
  }
  func.func @transform_1(%arg0: i32) -> (i32, i32) {
    %c0_i32 = arith.constant 0 : i32
    %c0_i32_0 = arith.constant 0 : i32
    %c0_i32_1 = arith.constant 0 : i32
    return %c0_i32, %c0_i32_0 : i32, i32
  }
  func.func @transform_2(%arg0: i32) -> (i32, i32) {
    %c0_i32 = arith.constant 0 : i32
    %c0_i32_0 = arith.constant 0 : i32
    %c0_i32_1 = arith.constant 0 : i32
    return %c0_i32, %c0_i32_0 : i32, i32
  }
  func.func @transform_3(%arg0: i32) -> (i32, i32) {
    %c0_i32 = arith.constant 0 : i32
    %c0_i32_0 = arith.constant 0 : i32
    %c0_i32_1 = arith.constant 0 : i32
    return %c0_i32, %c0_i32_0 : i32, i32
  }
  func.func @transform_4(%arg0: i32) -> (i32, i32) {
    %c0_i32 = arith.constant 0 : i32
    %c0_i32_0 = arith.constant 0 : i32
    %c0_i32_1 = arith.constant 0 : i32
    return %c0_i32, %c0_i32_0 : i32, i32
  }
  func.func @transform_5(%arg0: i32) -> (i32, i32) {
    %c0_i32 = arith.constant 0 : i32
    %c0_i32_0 = arith.constant 0 : i32
    %c0_i32_1 = arith.constant 0 : i32
    return %c0_i32, %c0_i32_0 : i32, i32
  }
  func.func @transform_6(%arg0: i32) -> (i32, i32) {
    %c0_i32 = arith.constant 0 : i32
    %c0_i32_0 = arith.constant 0 : i32
    return %c0_i32, %arg0 : i32, i32
  }
  func.func @transform_7(%arg0: i32) -> (i32, i32) {
    %c0_i32 = arith.constant 0 : i32
    %c0_i32_0 = arith.constant 0 : i32
    return %c0_i32, %arg0 : i32, i32
  }
}

</mosaic_0001>

<bundles_post_ra>
// kernel: tpu_custom_call.1
= control target key start
LH: loop header
LB: loop body
LE: loop exit
PB: predicated region body
PF: predicated region fallthrough
CT: control target
= control target key end

     0   :  { %13 = vsyncpa [#allocation3], 0  ;;  %s1813_s0 = inlined_call_operand.vmem [shape: f32[2,1024], index: 0, kind: input, shape index: {}]   ;;  %s1814_s1 = inlined_call_operand.vmem [shape: f32[32,1], index: 1, kind: input, shape index: {}]   ;;  %s1815_s2 = inlined_call_operand.vmem [shape: f32[32,1], index: 2, kind: input, shape index: {}]   ;;  %s1816_s3 = inlined_call_operand.vmem [shape: f32[32,1], index: 3, kind: input, shape index: {}]   ;;  %s1817_s4 = inlined_call_operand.vmem [shape: f32[16,32], index: 4, kind: input, shape index: {}]   ;;  %s1818_s5 = inlined_call_operand.vmem [shape: f32[16,1], index: 5, kind: input, shape index: {}]   ;;  %s1819_s6 = inlined_call_operand.hbm [shape: f32[8,1024], index: 6, kind: output, shape index: {0}]   ;;  %s1820_s7 = inlined_call_operand.hbm [shape: f32[8,1024], index: 7, kind: output, shape index: {1}]  }
   0x1   :  { %15 = vsyncpa [#allocation3 + $0x1], 0 }
   0x2   :  { %16 = vsyncpa [#allocation5], 0 }
   0x3   :  { %18 = vsyncpa [#allocation5 + $0x1], 0  ;;  %s1292_s24 = smov 0   ;;  %s1294_s25 = smov 0  }
   0x4   :  { %s1296_s26 = smov 0   ;;  %s1298_s27 = smov 0  }
   0x5 LB: > { %s1313_s28 = sadd.s32 4294967295, %s1246_s27   ;;  %s1013_s29 = sadd.s32 4294967294, %s1246_s27   ;;  %s1246_s27 = sphi %s1298_s27, %s1852_s27   ;;  %s1242_s26 = sphi %s1296_s26, %s1851_s26   ;;  %s1238_s25 = sphi %s1294_s25, %s1850_s25   ;;  %s1234_s24 = sphi %s1292_s24, %s1849_s24  }
   0x6   : > { %s1317_s30 = sadd.s32 1, %s1246_s27   ;;  %s162_s8 = sadd.s32 1, %s1242_s26 }
   0x7   : > { %s159_s9 = ssub.s32 %s1246_s27, %s1317_s30  ;;  %p172_p0 = scmp.ne.s32.totalorder %s1242_s26, %s1238_s25 }
   0x8   : > { %p160_p1 = scmp.eq.s32.totalorder %s159_s9, 0  ;;  %p173_p2 = scmp.eq.s32.totalorder %s1313_s28, 1 }
   0x9   : > { %p178_p3 = scmp.ne.s32.totalorder %s1238_s25, %s1234_s24  ;;  %p179_p4 = scmp.eq.s32.totalorder %s1013_s29, 1 }
   0xa   : > { %s1328_s10 = scalar_select %p160_p1, %s1242_s26, %s162_s8  }
   0xb   : > { %p1330_p5 = por %p173_p2, %p172_p0  ;;  %p1334_p6 = por %p179_p4, %p178_p3 }
   0xc   : > { %p1016_p7 = scmp.ge.s32.totalorder %s1246_s27, 1  ;;  %p247_p8 = scmp.lt.s32.totalorder %s1246_s27, 3 }
   0xe   : > { %p248_p9 = pnand %p1016_p7, %p247_p8 }
   0xf   : > { %s1019_s13 = sshll.u32 (!%p248_p9), %s1313_s28, 2  ;;  %s1734_s22 = sand.u32 (!%p248_p9), 1, %s1238_s25  }
  0x10   : > { %251 = sbr.rel (%p248_p9) target bundleno = 477 (0x1dd), region = 44  ;;  %p285_p10 = scmp.lt.s32.totalorder (!%p248_p9), %s1019_s13, 7 }
  0x11   : > { %s1017_s23 = sshll.u32 (!%p248_p9), %s1734_s22, 5  ;;  %s1821_s8 = sshll.u32 (!%p248_p9), %s1313_s28, 9 }
  0x12   : > { %s276_s29 = scalar_lea.vmem (!%p248_p9), [#allocation2], %s1017_s23  ;;  %s1745_s15 = scalar_lea.hbm (!%p248_p9), %s1819_s6, %s1821_s8 }
  0x13   : > { %s908_s9 = sshll.u32 (!%p248_p9), %s276_s29, 4  ;;  %s889_s16 = scalar_lea.sflag (!%p248_p9), [#allocation3], %s1734_s22  ;;  %s1747_s9 = int_to_ptr.vmem [resolvable:$true] %s908_s9 }
  0x14   : > { %s1250_s18 = smov (!%p248_p9), [#allocation2]  }
  0x15   : > { %v298_v0 = vld [vmem:[%s1814_s1 + $0x18] sm:$0xff]  ;;  %v297_v1 = vld [vmem:[%s1814_s1 + $0x10] sm:$0xff]  ;;  %v1248_v2 = vmov 0   ;;  %v357_v5 = vld [vmem:[%s1815_s2 + $0x8] sm:$0xff]  ;;  %v1249_v15 = vmov 0.0   ;;  %s1854_s13 = smov (!%p285_p10, %s1019_s13), 7  ;;  %v320_v16 = vlaneseq }
  0x16   : > { %1083 = vset.pattern.permute.xlu1 %v1248_v2  ;;  %1082 = vset.pattern.permute.xlu0 %v1248_v2  ;;  %v359_v3 = vld [vmem:[%s1815_s2 + $0x18] sm:$0xff]  ;;  %v358_v4 = vld [vmem:[%s1815_s2 + $0x10] sm:$0xff]  ;;  %v296_v6 = vld [vmem:[%s1814_s1 + $0x8] sm:$0xff]  ;;  %s1020_s14 = sshll.u32 %s1854_s13, 1  ;;  %s1160_s19 = sshll.u32 %s1250_s18, 4  ;;  %s1161_s19 = int_to_ptr.vmem [resolvable:$false] %s1160_s19 }
  0x17   : > { %316 = vperm.xlu0 %1082, %v298_v0   ;;  %311 = vperm.xlu1 %1083, %v297_v1   ;;  %v436_v7 = vld [vmem:[%s1816_s3 + $0x18] sm:$0xff]  ;;  %v295_v8 = vld [vmem:[%s1814_s1] sm:$0xff]  ;;  %v435_v10 = vld [vmem:[%s1816_s3 + $0x10] sm:$0xff]  ;;  %v321_v17 = vshrl.u32 %v320_v16, 7  ;;  %s288_s17 = scalar_lea.vmem %s1813_s0, %s1020_s14  ;;  %s1162_s20 = scalar_lea.vmem %s1161_s19, 1024 }
  0x18   : > { %v356_v9 = vld [vmem:[%s1815_s2] sm:$0xff]  ;;  %v434_v11 = vld [vmem:[%s1816_s3 + $0x8] sm:$0xff]  ;;  %782 = vmatprep.mubr.f32.mxu0 %v1249_v15  ;;  %859 = vmatprep.mubr.f32.mxu1 %v1249_v15  ;;  %p1163_p0 = scmp.lt.s32.totalorder %s1747_s9, %s1161_s19 }
  0x19   : > { %v433_v12 = vld [vmem:[%s1816_s3] sm:$0xff]  ;;  %v700_v13 = vld [vmem:[%s1818_s5 + $0x8] sm:$0xff]  ;;  %v322_v20 = vsub.s32 0, %v321_v17  ;;  %v326_v21 = vsub.s32 1, %v321_v17  ;;  %v330_v22 = vsub.s32 2, %v321_v17  ;;  %v334_v23 = vsub.s32 3, %v321_v17 }
  0x1a   : > { %v699_v14 = vld [vmem:[%s1818_s5] sm:$0xff] }
  0x1b   : > { %377 = vperm.xlu0 %1082, %v359_v3   ;;  %372 = vperm.xlu1 %1083, %v358_v4   ;;  %v292_v24 = vld [vmem:[%s288_s17] ss:$2 sm:$0xf]  ;;  %v1021_v27 = vld [vmem:[%s288_s17 + $0x1] ss:$2 sm:$0xf] }
  0x1c   : > { %v1388_v28 = vrot.slane %v292_v24, %v322_v20  ;;  %v1390_v29 = vrot.slane %v292_v24, %v326_v21  ;;  %v1392_v30 = vrot.slane %v292_v24, %v330_v22  ;;  %v1394_v31 = vrot.slane %v292_v24, %v334_v23  ;;  %s1156_s17 = scalar_lea.vmem %s1747_s9, 512 }
  0x1d   : > { %v1396_v32 = vrot.slane %v1021_v27, %v322_v20  ;;  %v1398_v33 = vrot.slane %v1021_v27, %v326_v21  ;;  %v1400_v34 = vrot.slane %v1021_v27, %v330_v22  ;;  %v1402_v35 = vrot.slane %v1021_v27, %v334_v23  ;;  %p1157_p11 = scmp.ne.s32.totalorder %s1747_s9, %s1156_s17  ;;  %p1164_p1 = scmp.lt.s32.totalorder %s1162_s20, %s1156_s17 }
  0x1f   : > { %367 = vperm.xlu1 %1083, %v357_v5   ;;  %306 = vperm.xlu0 %1082, %v296_v6   ;;  %p1158_p12 = pnand %p1157_p11, %p1330_p5  ;;  %p1165_p2 = por %p1164_p1, %p1163_p0 }
  0x21   : > { %p1159_p13 = pneg %p1158_p12 }
  0x23   : > { %454 = vperm.xlu0 %1082, %v436_v7   ;;  %301 = vperm.xlu1 %1083, %v295_v8   ;;  %p1166_p3 = pnand %p1165_p2, %p1159_p13 }
  0x27   : > { %362 = vperm.xlu0 %1082, %v356_v9   ;;  %449 = vperm.xlu1 %1083, %v435_v10  }
  0x2b   : > { %444 = vperm.xlu0 %1082, %v434_v11   ;;  %439 = vperm.xlu1 %1083, %v433_v12  }
  0x2f   : > { %708 = vperm.xlu0 %1082, %v700_v13   ;;  %703 = vperm.xlu1 %1083, %v699_v14  }
  0x92   : > { %v317_v18 = vpop.permute.xlu0 %316  ;;  %v312_v19 = vpop.permute.xlu1 %311 }
  0x93   : > { %v352_v38 = vmul.f32 %v1388_v28, %v317_v18  ;;  %v353_v39 = vmul.f32 %v1390_v29, %v317_v18  ;;  %v354_v40 = vmul.f32 %v1392_v30, %v317_v18  ;;  %v355_v41 = vmul.f32 %v1394_v31, %v317_v18 }
  0x94   : > { %v348_v42 = vmul.f32 %v1388_v28, %v312_v19  ;;  %v349_v43 = vmul.f32 %v1390_v29, %v312_v19  ;;  %v350_v50 = vmul.f32 %v1392_v30, %v312_v19  ;;  %v351_v51 = vmul.f32 %v1394_v31, %v312_v19 }
  0x96   : > { %v378_v25 = vpop.permute.xlu0 %377  ;;  %v373_v26 = vpop.permute.xlu1 %372 }
  0x97   : > { %v409_v44 = vmul.f32 %v1396_v32, %v373_v26  ;;  %v410_v45 = vmul.f32 %v1398_v33, %v373_v26  ;;  %v411_v46 = vmul.f32 %v1400_v34, %v373_v26  ;;  %v412_v47 = vmul.f32 %v1402_v35, %v373_v26 }
  0x98   : > { %v414_v52 = vmul.f32 %v1398_v33, %v378_v25  ;;  %v416_v53 = vmul.f32 %v1402_v35, %v378_v25  ;;  %v413_v54 = vmul.f32 %v1396_v32, %v378_v25  ;;  %v415_v55 = vmul.f32 %v1400_v34, %v378_v25 }
  0x99   : > { %v425_v0 = vadd.f32 %v409_v44, %v348_v42  ;;  %v426_v1 = vadd.f32 %v410_v45, %v349_v43  ;;  %v427_v2 = vadd.f32 %v411_v46, %v350_v50  ;;  %v428_v3 = vadd.f32 %v412_v47, %v351_v51 }
  0x9a   : > { %v368_v36 = vpop.permute.xlu1 %367  ;;  %v307_v37 = vpop.permute.xlu0 %306  ;;  %v430_v6 = vadd.f32 %v414_v52, %v353_v39  ;;  %v432_v7 = vadd.f32 %v416_v53, %v355_v41  ;;  %v429_v16 = vadd.f32 %v413_v54, %v352_v38  ;;  %v431_v25 = vadd.f32 %v415_v55, %v354_v40 }
  0x9b   : > { %v405_v56 = vmul.f32 %v1396_v32, %v368_v36  ;;  %v406_v57 = vmul.f32 %v1398_v33, %v368_v36  ;;  %v408_v58 = vmul.f32 %v1402_v35, %v368_v36  ;;  %v344_v59 = vmul.f32 %v1388_v28, %v307_v37 }
  0x9c   : > { %v345_v60 = vmul.f32 %v1390_v29, %v307_v37  ;;  %v347_v61 = vmul.f32 %v1394_v31, %v307_v37  ;;  %v407_v4 = vmul.f32 %v1400_v34, %v368_v36  ;;  %v346_v5 = vmul.f32 %v1392_v30, %v307_v37 }
  0x9d   : > { %v421_v12 = vadd.f32 %v405_v56, %v344_v59 }
  0x9e   : > { %v1414_v48 = vpop.permute.xlu0 %454  ;;  %v1416_v49 = vpop.permute.xlu1 %301  ;;  %v422_v13 = vadd.f32 %v406_v57, %v345_v60  ;;  %v424_v14 = vadd.f32 %v408_v58, %v347_v61  ;;  %v423_v37 = vadd.f32 %v407_v4, %v346_v5 }
  0x9f   : > { %v340_v38 = vmul.f32 %v1388_v28, %v1416_v49  ;;  %v1454_v42 = vadd.f32 %v1414_v48, %v430_v6  ;;  %v1461_v47 = vadd.f32 %v1414_v48, %v432_v7  ;;  %v341_v28 = vmul.f32 %v1390_v29, %v1416_v49 }
  0xa0   : > { %v342_v50 = vmul.f32 %v1392_v30, %v1416_v49  ;;  %v343_v59 = vmul.f32 %v1394_v31, %v1416_v49 }
  0xa1   : > { %v486_v29 = vmin.f32 %v1454_v42, 20.0  ;;  %v488_v58 = vmin.f32 %v1461_v47, 20.0  ;;  %vm534_vm8 = vcmp.gt.f32.partialorder %v1454_v42, 20.0  ;;  %vm536_vm10 = vcmp.gt.f32.partialorder %v1461_v47, 20.0 }
  0xa2   : > { %v363_v62 = vpop.permute.xlu0 %362  ;;  %v450_v63 = vpop.permute.xlu1 %449 }
  0xa3   : > { %v1432_v8 = vadd.f32 %v450_v63, %v425_v0  ;;  %v1434_v9 = vadd.f32 %v450_v63, %v426_v1  ;;  %v1436_v10 = vadd.f32 %v450_v63, %v427_v2  ;;  %v1438_v11 = vadd.f32 %v450_v63, %v428_v3 }
  0xa4   : > { %v401_v43 = vmul.f32 %v1396_v32, %v363_v62  ;;  %v402_v45 = vmul.f32 %v1398_v33, %v363_v62  ;;  %v1468_v32 = vadd.f32 %v1414_v48, %v429_v16  ;;  %v403_v51 = vmul.f32 %v1400_v34, %v363_v62 }
  0xa5   : > { %v481_v17 = vmin.f32 %v1432_v8, 20.0  ;;  %v482_v18 = vmin.f32 %v1434_v9, 20.0  ;;  %v483_v19 = vmin.f32 %v1436_v10, 20.0  ;;  %v484_v20 = vmin.f32 %v1438_v11, 20.0 }
  0xa6   : > { %v445_v21 = vpop.permute.xlu0 %444  ;;  %v1472_v33 = vadd.f32 %v1414_v48, %v431_v25  ;;  %v417_v55 = vadd.f32 %v401_v43, %v340_v38  ;;  %v404_v56 = vmul.f32 %v1402_v35, %v363_v62  ;;  %v440_v30 = vpop.permute.xlu1 %439  ;;  %v418_v57 = vadd.f32 %v402_v45, %v341_v28 }
  0xa7   : > { %v1444_v22 = vadd.f32 %v445_v21, %v421_v12  ;;  %v1446_v23 = vadd.f32 %v445_v21, %v422_v13  ;;  %v1448_v24 = vadd.f32 %v445_v21, %v424_v14  ;;  %v505_v26 = vmul.f32 1.442695, %v481_v17 }
  0xa8   : > { %v507_v27 = vmul.f32 1.442695, %v482_v18  ;;  %v509_v36 = vmul.f32 1.442695, %v483_v19  ;;  %v511_v39 = vmul.f32 1.442695, %v484_v20  ;;  %v1474_v53 = vadd.f32 %v445_v21, %v423_v37 }
  0xa9   : > { %v478_v41 = vmin.f32 %v1446_v23, 20.0  ;;  %1084 = vpow2.f32 %v505_v26  ;;  %v477_v44 = vmin.f32 %v1444_v22, 20.0  ;;  %v480_v40 = vmin.f32 %v1448_v24, 20.0 }
  0xaa   : > { %1086 = vpow2.f32 %v507_v27  ;;  %v485_v34 = vmin.f32 %v1468_v32, 20.0  ;;  %v419_v48 = vadd.f32 %v403_v51, %v342_v50  ;;  %v487_v60 = vmin.f32 %v1472_v33, 20.0 }
  0xab   : > { %v499_v46 = vmul.f32 1.442695, %v478_v41  ;;  %1088 = vpow2.f32 %v509_v36  ;;  %v503_v52 = vmul.f32 1.442695, %v480_v40  ;;  %v497_v54 = vmul.f32 1.442695, %v477_v44 }
  0xac   : > { %1090 = vpow2.f32 %v511_v39  ;;  %v479_v61 = vmin.f32 %v1474_v53, 20.0  ;;  %v1484_v63 = vadd.f32 %v440_v30, %v417_v55  ;;  %v515_v35 = vmul.f32 1.442695, %v486_v29 }
  0xad   : > { %1092 = vpow2.f32 %v499_v46  ;;  %v420_v62 = vadd.f32 %v404_v56, %v343_v59  ;;  %v1486_v0 = vadd.f32 %v440_v30, %v418_v57  ;;  %v519_v1 = vmul.f32 1.442695, %v488_v58 }
  0xae   : > { %1094 = vpow2.f32 %v503_v52  ;;  %v513_v2 = vmul.f32 1.442695, %v485_v34  ;;  %v1488_v3 = vadd.f32 %v440_v30, %v419_v48  ;;  %v517_v4 = vmul.f32 1.442695, %v487_v60 }
  0xaf   : > { %1096 = vpow2.f32 %v497_v54  ;;  %v501_v5 = vmul.f32 1.442695, %v479_v61  ;;  %v473_v31 = vmin.f32 %v1484_v63, 20.0  ;;  %v1493_v6 = vadd.f32 %v440_v30, %v420_v62 }
  0xb0   : > { %1098 = vpow2.f32 %v515_v35  ;;  %v474_v7 = vmin.f32 %v1486_v0, 20.0  ;;  %v475_v16 = vmin.f32 %v1488_v3, 20.0  ;;  %vm530_vm3 = vcmp.gt.f32.partialorder %v1434_v9, 20.0 }
  0xb1   : > { %1100 = vpow2.f32 %v519_v1  ;;  %v489_v19 = vmul.f32 1.442695, %v473_v31  ;;  %v476_v20 = vmin.f32 %v1493_v6, 20.0  ;;  %vm532_vm4 = vcmp.gt.f32.partialorder %v1438_v11, 20.0 }
  0xb2   : > { %1102 = vpow2.f32 %v513_v2  ;;  %v491_v21 = vmul.f32 1.442695, %v474_v7  ;;  %v493_v36 = vmul.f32 1.442695, %v475_v16  ;;  %vm529_vm5 = vcmp.gt.f32.partialorder %v1432_v8, 20.0 }
  0xb3   : > { %1104 = vpow2.f32 %v517_v4  ;;  %v495_v44 = vmul.f32 1.442695, %v476_v20  ;;  %vm531_vm15 = vcmp.gt.f32.partialorder %v1436_v10, 20.0  ;;  %vm525_vm12 = vcmp.gt.f32.partialorder %v1444_v22, 20.0 }
  0xb4   : > { %1106 = vpow2.f32 %v501_v5 }
  0xb6   : > { %v1491_v49 = vpop.eup %1084 }
  0xb7   : > { %v1087_v12 = vpop.eup %1086  ;;  %v609_v13 = vadd.f32 1.0, %v1491_v49  ;;  %v612_v37 = vmul.f32 -0.5, %v1491_v49  ;;  %v615_v56 = vand.u32 2147483647, %v1491_v49 }
  0xb8   : > { %v1497_v14 = vpop.eup %1088  ;;  %v618_v17 = vadd.f32 1.0, %v1087_v12  ;;  %v621_v39 = vmul.f32 -0.5, %v1087_v12  ;;  %v624_v51 = vand.u32 2147483647, %v1087_v12 }
  0xb9   : > { %v1091_v18 = vpop.eup %1090  ;;  %v627_v27 = vadd.f32 1.0, %v1497_v14  ;;  %v630_v45 = vmul.f32 -0.5, %v1497_v14  ;;  %v613_v28 = vadd.f32 1.0, %v612_v37  ;;  %v633_v4 = vand.u32 2147483647, %v1497_v14 }
  0xba   : > { %1108 = vlog2.f32 %v618_v17  ;;  %v636_v25 = vadd.f32 1.0, %v1091_v18  ;;  %v1501_v26 = vpop.eup %1092  ;;  %v639_v40 = vmul.f32 -0.5, %v1091_v18  ;;  %v622_v50 = vadd.f32 1.0, %v621_v39 }
  0xbb   : > { %1110 = vlog2.f32 %v609_v13  ;;  %v1505_v38 = vpop.eup %1094  ;;  %v582_v41 = vadd.f32 1.0, %v1501_v26  ;;  %v642_v29 = vand.u32 2147483647, %v1091_v18  ;;  %v631_v58 = vadd.f32 1.0, %v630_v45 }
  0xbc   : > { %1112 = vlog2.f32 %v636_v25  ;;  %v1508_v43 = vpop.eup %1096  ;;  %v600_v46 = vadd.f32 1.0, %v1505_v38  ;;  %v640_v55 = vadd.f32 1.0, %v639_v40  ;;  %v585_v34 = vmul.f32 -0.5, %v1501_v26 }
  0xbd   : > { %1114 = vpow2.f32 %v489_v19  ;;  %v573_v52 = vadd.f32 1.0, %v1508_v43  ;;  %v1513_v54 = vpop.eup %1098  ;;  %v1524_v60 = vmul.f32 %v1491_v49, %v613_v28  ;;  %v603_v61 = vmul.f32 -0.5, %v1505_v38 }
  0xbe   : > { %1116 = vpow2.f32 %v491_v21  ;;  %v1516_v30 = vpop.eup %1100  ;;  %v654_v57 = vadd.f32 1.0, %v1513_v54  ;;  %v1530_v1 = vmul.f32 %v1087_v12, %v622_v50  ;;  %vm1532_vm0 = vcmp.lt.f32.partialorder %v624_v51, 0.0004427343 }
  0xbf   : > { %1118 = vlog2.f32 %v627_v27  ;;  %v1520_v59 = vpop.eup %1102  ;;  %v672_v48 = vadd.f32 1.0, %v1516_v30  ;;  %v657_v31 = vmul.f32 -0.5, %v1513_v54  ;;  %v1540_v49 = vmul.f32 %v1091_v18, %v640_v55 }
  0xc0   : > { %1120 = vpow2.f32 %v493_v36  ;;  %v1527_v35 = vpop.eup %1104  ;;  %v645_v62 = vadd.f32 1.0, %v1520_v59  ;;  %vm1542_vm1 = vcmp.lt.f32.partialorder %v642_v29, 0.0004427343  ;;  %vm1546_vm2 = vcmp.lt.f32.partialorder %v615_v56, 0.0004427343 }
  0xc1   : > { %1122 = vlog2.f32 %v582_v41  ;;  %v1537_v5 = vpop.eup %1106  ;;  %v588_v13 = vand.u32 2147483647, %v1501_v26  ;;  %v663_v17 = vadd.f32 1.0, %v1527_v35  ;;  %v1553_v19 = vmul.f32 %v1497_v14, %v631_v58 }
  0xc2   : > { %1124 = vpow2.f32 %v495_v44  ;;  %v586_v20 = vadd.f32 1.0, %v585_v34  ;;  %v675_v21 = vmul.f32 -0.5, %v1516_v30  ;;  %v648_v25 = vmul.f32 -0.5, %v1520_v59 }
  0xc3   : > { %1126 = vlog2.f32 %v600_v46  ;;  %v604_v27 = vadd.f32 1.0, %v603_v61  ;;  %v606_v36 = vand.u32 2147483647, %v1505_v38  ;;  %v660_v39 = vand.u32 2147483647, %v1513_v54 }
  0xc4   : > { %1128 = vlog2.f32 %v573_v52  ;;  %v666_v41 = vmul.f32 -0.5, %v1527_v35  ;;  %v576_v14 = vmul.f32 -0.5, %v1508_v43  ;;  %v658_v40 = vadd.f32 1.0, %v657_v31 }
  0xc5   : > { %1130 = vlog2.f32 %v654_v57  ;;  %v678_v45 = vand.u32 2147483647, %v1516_v30  ;;  %vm1567_vm6 = vcmp.lt.f32.partialorder %v633_v4, 0.0004427343  ;;  %v591_v50 = vadd.f32 1.0, %v1537_v5 }
  0xc6   : > { %1132 = vlog2.f32 %v672_v48  ;;  %v1575_v29 = vmul.f32 %v1501_v26, %v586_v20  ;;  %v579_v56 = vand.u32 2147483647, %v1508_v43  ;;  %v676_v58 = vadd.f32 1.0, %v675_v21 }
  0xc7   : > { %v1109_v16 = vpop.eup %1108  ;;  %1134 = vlog2.f32 %v645_v62  ;;  %v649_v34 = vadd.f32 1.0, %v648_v25  ;;  %v651_v48 = vand.u32 2147483647, %v1520_v59  ;;  %vm1579_vm7 = vcmp.lt.f32.partialorder %v588_v13, 0.0004427343 }
  0xc8   : > { %v1111_v18 = vpop.eup %1110  ;;  %1136 = vlog2.f32 %v663_v17  ;;  %v620_v46 = vmul.f32 0.6931472, %v1109_v16  ;;  %v1584_v62 = vmul.f32 -0.5, %v1537_v5  ;;  %vm1589_vm9 = vcmp.lt.f32.partialorder %v660_v39, 0.0004427343 }
  0xc9   : > { %v1113_v37 = vpop.eup %1112  ;;  %v611_v55 = vmul.f32 0.6931472, %v1111_v18  ;;  %v667_v31 = vadd.f32 1.0, %v666_v41  ;;  %v669_v16 = vand.u32 2147483647, %v1527_v35  ;;  %v1595_v17 = vmul.f32 %v1505_v38, %v604_v27 }
  0xca   : > { %v1564_v44 = vpop.eup %1114  ;;  %v638_v52 = vmul.f32 0.6931472, %v1113_v37  ;;  %v659_v20 = vmul.f32 %v1513_v54, %v658_v40  ;;  %vm1599_vm11 = vcmp.lt.f32.partialorder %v678_v45, 0.0004427343  ;;  %v626_v21 = vsel %vm1532_vm0, %v1530_v1, %v620_v46 }
  0xcb   : > { %v1572_v51 = vpop.eup %1116  ;;  %1138 = vlog2.f32 %v591_v50  ;;  %v617_v54 = vsel %vm1546_vm2, %v1524_v60, %v611_v55  ;;  %vm1615_vm13 = vcmp.lt.f32.partialorder %v606_v36, 0.0004427343  ;;  %v677_v39 = vmul.f32 %v1516_v30, %v676_v58 }
  0xcc   : > { %v1119_v57 = vpop.eup %1118  ;;  %v644_v38 = vsel %vm1542_vm1, %v1540_v49, %v638_v52  ;;  %v546_v1 = vadd.f32 1.0, %v1572_v51  ;;  %v650_v41 = vmul.f32 %v1520_v59, %v649_v34  ;;  %vm1622_vm14 = vcmp.lt.f32.partialorder %v651_v48, 0.0004427343 }
  0xcd   : > { %v1586_v4 = vpop.eup %1120  ;;  %v629_v27 = vmul.f32 0.6931472, %v1119_v57  ;;  %vm526_vm0 = vcmp.gt.f32.partialorder %v1446_v23, 20.0  ;;  %v577_v60 = vadd.f32 1.0, %v576_v14  ;;  %v668_v7 = vmul.f32 %v1527_v35, %v667_v31 }
  0xce   : > { %v1123_v13 = vpop.eup %1122  ;;  %vm1630_vm2 = vcmp.lt.f32.partialorder %v669_v16, 0.0004427343  ;;  %1140 = vlog2.f32 %v546_v1  ;;  %v690_v36 = vsel %vm530_vm3, %v1434_v9, %v626_v21  ;;  %v692_v14 = vsel %vm532_vm4, %v1438_v11, %v644_v38 }
  0xcf   : > { %v1606_v25 = vpop.eup %1124  ;;  %v584_v30 = vmul.f32 0.6931472, %v1123_v13  ;;  %v689_v35 = vsel %vm529_vm5, %v1432_v8, %v617_v54  ;;  %vm528_vm1 = vcmp.gt.f32.partialorder %v1448_v24, 20.0  ;;  %v635_v52 = vsel %vm1567_vm6, %v1553_v19, %v629_v27 }
  0xd0   : > { %v1127_v2 = vpop.eup %1126  ;;  %v564_v45 = vadd.f32 1.0, %v1606_v25  ;;  %v537_v9 = vadd.f32 1.0, %v1564_v44  ;;  %v578_v34 = vmul.f32 %v1508_v43, %v577_v60  ;;  %vm1656_vm3 = vcmp.lt.f32.partialorder %v579_v56, 0.0004427343 }
  0xd1   : > { %v1129_v49 = vpop.eup %1128  ;;  %v602_v11 = vmul.f32 0.6931472, %v1127_v2  ;;  %v590_v31 = vsel %vm1579_vm7, %v1575_v29, %v584_v30  ;;  %v549_v26 = vmul.f32 -0.5, %v1572_v51  ;;  %vm1846_vm4 = vcmp.gt.f32.partialorder %v1468_v32, 20.0 }
  0xd2   : > { %v1131_v59 = vpop.eup %1130  ;;  %v575_v55 = vmul.f32 0.6931472, %v1129_v49  ;;  %1142 = vlog2.f32 %v564_v45  ;;  %v595_v18 = vadd.f32 1.0, %v1584_v62  ;;  %v691_v38 = vsel %vm531_vm15, %v1436_v10, %v635_v52 }
  0xd3   : > { %v1133_v46 = vpop.eup %1132  ;;  %v656_v50 = vmul.f32 0.6931472, %v1131_v59  ;;  %1144 = vlog2.f32 %v537_v9  ;;  %v597_v54 = vand.u32 2147483647, %v1537_v5  ;;  %vm1847_vm5 = vcmp.gt.f32.partialorder %v1472_v33, 20.0 }
  0xd4   : > { %v1135_v57 = vpop.eup %1134  ;;  %v674_v58 = vmul.f32 0.6931472, %v1133_v46  ;;  %v581_v13 = vsel %vm1656_vm3, %v578_v34, %v575_v55  ;;  %v567_v27 = vmul.f32 -0.5, %v1606_v25  ;;  %v552_v2 = vand.u32 2147483647, %v1572_v51  ;;  %v698_v34 = vld [vmem:[%s1817_s4 + $0x8] sm:$0xff] }
  0xd5   : > { %v662_v8 = vsel %vm1589_vm9, %v659_v20, %v656_v50  ;;  %v647_v48 = vmul.f32 0.6931472, %v1135_v57  ;;  %v1137_v19 = vpop.eup %1136  ;;  %v608_v20 = vsel %vm1615_vm13, %v1595_v17, %v602_v11  ;;  %v685_v17 = vsel %vm525_vm12, %v1444_v22, %v581_v13 }
  0xd6   : > { %v694_v16 = vsel %vm534_vm8, %v1454_v42, %v662_v8  ;;  %v680_v43 = vsel %vm1599_vm11, %v677_v39, %v674_v58  ;;  %v665_v61 = vmul.f32 0.6931472, %v1137_v19  ;;  %v688_v10 = vsel %vm528_vm1, %v1448_v24, %v608_v20 }
  0xd7   : > { %742 = vmatprep.subr.mxu0 %v694_v16  ;;  %v696_v29 = vsel %vm536_vm10, %v1461_v47, %v680_v43  ;;  %v653_v56 = vsel %vm1622_vm14, %v650_v41, %v647_v48  ;;  %v555_v47 = vadd.f32 1.0, %v1586_v4  ;;  %v540_v22 = vmul.f32 -0.5, %v1564_v44 }
  0xd8   : > { %819 = vmatprep.subr.mxu1 %v696_v29  ;;  %v693_v42 = vsel %vm1846_vm4, %v1468_v32, %v653_v56  ;;  %v671_v21 = vsel %vm1630_vm2, %v668_v7, %v665_v61  ;;  %v686_v32 = vsel %vm526_vm0, %v1446_v23, %v590_v31  ;;  %v1139_v37 = vpop.eup %1138  ;;  %v550_v23 = vadd.f32 1.0, %v549_v26 }
  0xd9   : > { %743 = vmatpush1.msra.mxu0 %v693_v42  ;;  %v695_v62 = vsel %vm1847_vm5, %v1472_v33, %v671_v21  ;;  %1146 = vlog2.f32 %v555_v47  ;;  %v593_v1 = vmul.f32 0.6931472, %v1139_v37  ;;  %v596_v33 = vmul.f32 %v1537_v5, %v595_v18 }
  0xda   : > { %744 = vmatprep.subr.mxu0 %v690_v36  ;;  %820 = vmatpush1.msra.mxu1 %v695_v62  ;;  %vm598_vm6 = vcmp.lt.f32.partialorder %v597_v54, 0.0004427343  ;;  %vm527_vm7 = vcmp.gt.f32.partialorder %v1474_v53, 20.0  ;;  %v568_v40 = vadd.f32 1.0, %v567_v27  ;;  %v551_v49 = vmul.f32 %v1572_v51, %v550_v23 }
  0xdb   : > { %745 = vmatpush1.msra.mxu0 %v689_v35  ;;  %821 = vmatprep.subr.mxu1 %v692_v14  ;;  %v1141_v39 = vpop.eup %1140  ;;  %v599_v41 = vsel %vm598_vm6, %v596_v33, %v593_v1  ;;  %v570_v5 = vand.u32 2147483647, %v1606_v25  ;;  %vm553_vm8 = vcmp.lt.f32.partialorder %v552_v2, 0.0004427343  ;;  %v541_v7 = vadd.f32 1.0, %v540_v22 }
  0xdc   : > { %746 = vmatprep.subr.mxu0 %v686_v32  ;;  %822 = vmatpush1.msra.mxu1 %v691_v38  ;;  %v687_v24 = vsel %vm527_vm7, %v1474_v53, %v599_v41  ;;  %v548_v60 = vmul.f32 0.6931472, %v1141_v39  ;;  %v558_v12 = vmul.f32 -0.5, %v1586_v4  ;;  %vm522_vm9 = vcmp.gt.f32.partialorder %v1486_v0, 20.0 }
  0xdd   : > { %747 = vmatpush1.msra.mxu0 %v685_v17  ;;  %823 = vmatprep.subr.mxu1 %v688_v10  ;;  %v543_v36 = vand.u32 2147483647, %v1564_v44  ;;  %v569_v53 = vmul.f32 %v1606_v25, %v568_v40  ;;  %vm524_vm10 = vcmp.gt.f32.partialorder %v1493_v6, 20.0  ;;  %vm571_vm11 = vcmp.lt.f32.partialorder %v570_v5, 0.0004427343  ;;  %v697_v25 = vld [vmem:[%s1817_s4] sm:$0xff] }
  0xde   : > { %824 = vmatpush1.msra.mxu1 %v687_v24  ;;  %v554_v59 = vsel %vm553_vm8, %v551_v49, %v548_v60  ;;  %v542_v50 = vmul.f32 %v1564_v44, %v541_v7  ;;  %v559_v52 = vadd.f32 1.0, %v558_v12  ;;  %v561_v9 = vand.u32 2147483647, %v1586_v4 }
  0xdf   : > { %v1143_v30 = vpop.eup %1142  ;;  %v682_v14 = vsel %vm522_vm9, %v1486_v0, %v554_v59  ;;  %vm544_vm12 = vcmp.lt.f32.partialorder %v543_v36, 0.0004427343  ;;  %vm521_vm13 = vcmp.gt.f32.partialorder %v1484_v63, 20.0  ;;  %vm711_vm14 = vcmask 261120  }
  0xe0   : > { %v566_v35 = vmul.f32 0.6931472, %v1143_v30  ;;  %v1145_v45 = vpop.eup %1144  ;;  %748 = vmatprep.subr.mxu0 %v682_v14  ;;  %vm562_vm15 = vcmp.lt.f32.partialorder %v561_v9, 0.0004427343  ;;  %vm523_vm0 = vcmp.gt.f32.partialorder %v1488_v3, 20.0 }
  0xe1   : > { %v539_v46 = vmul.f32 0.6931472, %v1145_v45 }
  0xe2   : > { %v572_v51 = vsel %vm571_vm11, %v569_v53, %v566_v35 }
  0xe3   : > { %v684_v55 = vsel %vm524_vm10, %v1493_v6, %v572_v51  ;;  %v545_v0 = vsel %vm544_vm12, %v542_v50, %v539_v46  ;;  %v560_v6 = vmul.f32 %v1586_v4, %v559_v52 }
  0xe4   : > { %825 = vmatprep.subr.mxu1 %v684_v55  ;;  %v681_v58 = vsel %vm521_vm13, %v1484_v63, %v545_v0  ;;  %v704_v63 = vpop.permute.xlu1 %703 }
  0xe5   : > { %749 = vmatpush1.msra.mxu0 %v681_v58 }
  0xe6   : > { %v1147_v57 = vpop.eup %1146  ;;  %1022 = vmatmul.mubr.msk.f32.vlgmr.msra.gmra.mxu0 %vm711_vm14, %v697_v25 }
  0xe7   : > { %v557_v44 = vmul.f32 0.6931472, %v1147_v57  ;;  %788 = vmatprep.mubr.f32.mxu0 %v1249_v15 }
  0xe9   : > { %v563_v11 = vsel %vm562_vm15, %v560_v6, %v557_v44 }
  0xea   : > { %v683_v8 = vsel %vm523_vm0, %v1488_v3, %v563_v11  ;;  %1023 = vmatmul.mubr.msk.f32.gmra.mxu0 %vm711_vm14, %v698_v34  ;;  %v709_v3 = vpop.permute.xlu0 %708 }
  0xeb   : > { %826 = vmatpush1.msra.mxu1 %v683_v8 }
  0xec   : > { %1024 = vmatmul.mubr.msk.f32.vlgmr.msra.gmra.mxu1 %vm711_vm14, %v697_v25 }
  0xed   : > { %865 = vmatprep.mubr.f32.mxu1 %v1249_v15 }
  0xf0   : > { %1025 = vmatmul.mubr.msk.f32.gmra.mxu1 %vm711_vm14, %v698_v34 }
 0x1a6   : > { %v784_v4 = vpop.f32.mrf.mxu0 }
 0x1a7   : > { %v785_v48 = vadd.f32 %v784_v4, %v704_v63 }
 0x1a8   : > { %v786_v31 = vpop.f32.mrf.mxu0 }
 0x1a9   : > { %872 = vst [vmem:[%s276_s29] sm:$0xff] %v785_v48  ;;  %v787_v28 = vadd.f32 %v786_v31, %v704_v63 }
 0x1aa   : > { %v790_v16 = vpop.f32.mrf.mxu0 }
 0x1ab   : > { %873 = vst [vmem:[%s276_s29 + $0x8] sm:$0xff] %v787_v28  ;;  %v791_v43 = vadd.f32 %v790_v16, %v709_v3 }
 0x1ac   : > { %v861_v19 = vpop.f32.mrf.mxu1  ;;  %v792_v29 = vpop.f32.mrf.mxu0 }
 0x1ad   : > { %v862_v15 = vadd.f32 %v861_v19, %v704_v63  ;;  %v876_v61 = vmul.f32 1.442695, %v791_v43  ;;  %v793_v13 = vadd.f32 %v792_v29, %v709_v3 }
 0x1ae   : > { %v863_v26 = vpop.f32.mrf.mxu1 }
 0x1af   : > { %874 = vst [vmem:[%s276_s29 + $0x10] sm:$0xff] %v862_v15  ;;  %v864_v56 = vadd.f32 %v863_v26, %v704_v63  ;;  %1148 = vpow2.f32 %v876_v61  ;;  %v878_v18 = vmul.f32 1.442695, %v793_v13 }
 0x1b0   : > { %v867_v42 = vpop.f32.mrf.mxu1 }
 0x1b1   : > { %875 = vst [vmem:[%s276_s29 + $0x18] sm:$0xff] %v864_v56  ;;  %v868_v20 = vadd.f32 %v867_v42, %v709_v3 }
 0x1b2   : > { %v869_v47 = vpop.f32.mrf.mxu1 }
 0x1b3   : > { %1169 = shalt.err (!%p1166_p3)
}
 0x1b4   : > { %s1170_s21 = scalar_lea.hbm %s1745_s15, 512  ;;  %s1174_s14 = scalar_lea.hbm %s1819_s6, 1024 }
 0x1b5   : > { %p1171_p4 = scmp.ne.s32.totalorder %s1745_s15, %s1170_s21  ;;  %p1175_p9 = scmp.lt.s32.totalorder %s1745_s15, %s1819_s6 }
 0x1b6   : > { %p1176_p10 = scmp.lt.s32.totalorder %s1174_s14, %s1170_s21 }
 0x1b7   : > { %p1172_p7 = pnand %p1171_p4, %p1330_p5 }
 0x1b8   : > { %p1177_p11 = por %p1176_p10, %p1175_p9 }
 0x1b9   : > { %p1173_p8 = pneg %p1172_p7 }
 0x1bb   : > { %p1178_p12 = pnand %p1177_p11, %p1173_p8 }
 0x1bd   : > { %1181 = shalt.err (!%p1178_p12)
}
 0x1be   : > { %1036 = dma.vmem_to_hbm [thread:$0]  (%p1330_p5), %s1747_s9, 512, %s1745_s15, %s889_s16   ;;  %v880_v21 = vmul.f32 1.442695, %v868_v20  ;;  %1150 = vpow2.f32 %v878_v18  ;;  %v870_v38 = vadd.f32 %v869_v47, %v709_v3  ;;  %v1149_v54 = vpop.eup %1148 }
 0x1bf   : > { %s283_s8 = scalar_lea.vmem [#allocation4], %s1017_s23  ;;  %s1848_s19 = sshll.u32 %s1313_s28, 9 }
 0x1c0   : > { %1152 = vpow2.f32 %v880_v21  ;;  %v882_v32 = vmul.f32 1.442695, %v870_v38  ;;  %884 = vst [vmem:[%s283_s8] sm:$0xff] %v1149_v54  ;;  %s922_s17 = sshll.u32 %s283_s8, 4  ;;  %s1777_s15 = scalar_lea.hbm %s1820_s7, %s1848_s19  ;;  %s923_s17 = int_to_ptr.vmem [resolvable:$true] %s922_s17 }
 0x1c1   : > { %s894_s16 = scalar_lea.sflag [#allocation5], %s1734_s22  ;;  %s1182_s21 = scalar_lea.vmem %s923_s17, 512 }
 0x1c2   : > { %1154 = vpow2.f32 %v882_v32  ;;  %p1183_p13 = scmp.ne.s32.totalorder %s923_s17, %s1182_s21  ;;  %s1251_s23 = smov [#allocation4]  }
 0x1c3   : > { %s1186_s29 = sshll.u32 %s1251_s23, 4  ;;  %s1187_s29 = int_to_ptr.vmem [resolvable:$false] %s1186_s29 }
 0x1c4   : > { %p1184_p0 = pnand %p1183_p13, %p1330_p5  ;;  %s1188_s13 = scalar_lea.vmem %s1187_s29, 1024 }
 0x1c5   : > { %p1189_p2 = scmp.lt.s32.totalorder %s923_s17, %s1187_s29  ;;  %p1190_p3 = scmp.lt.s32.totalorder %s1188_s13, %s1182_s21 }
 0x1c6   : > { %p1185_p1 = pneg %p1184_p0 }
 0x1c7   : > { %p1191_p4 = por %p1190_p3, %p1189_p2 }
 0x1c9   : > { %p1192_p7 = pnand %p1191_p4, %p1185_p1 }
 0x1cb   : > { %v1151_v62 = vpop.eup %1150 }
 0x1cc   : > { %885 = vst [vmem:[%s283_s8 + $0x8] sm:$0xff] %v1151_v62 }
 0x1cd   : > { %v1153_v17 = vpop.eup %1152 }
 0x1ce   : > { %886 = vst [vmem:[%s283_s8 + $0x10] sm:$0xff] %v1153_v17 }
 0x1cf   : > { %v1155_v27 = vpop.eup %1154 }
 0x1d0   : > { %887 = vst [vmem:[%s283_s8 + $0x18] sm:$0xff] %v1155_v27 }
 0x1d1   : > { %1195 = shalt.err (!%p1192_p7)
}
 0x1d2   : > { %s1196_s28 = scalar_lea.hbm %s1777_s15, 512  ;;  %s1200_s18 = scalar_lea.hbm %s1820_s7, 1024 }
 0x1d3   : > { %p1197_p8 = scmp.ne.s32.totalorder %s1777_s15, %s1196_s28  ;;  %p1201_p11 = scmp.lt.s32.totalorder %s1777_s15, %s1820_s7 }
 0x1d4   : > { %p1202_p12 = scmp.lt.s32.totalorder %s1200_s18, %s1196_s28 }
 0x1d5   : > { %p1198_p9 = pnand %p1197_p8, %p1330_p5 }
 0x1d6   : > { %p1203_p13 = por %p1202_p12, %p1201_p11 }
 0x1d7   : > { %p1199_p10 = pneg %p1198_p9 }
 0x1d9   : > { %p1204_p0 = pnand %p1203_p13, %p1199_p10 }
 0x1db   : > { %1207 = shalt.err (!%p1204_p0)
}
 0x1dc   : > { %1037 = dma.vmem_to_hbm [thread:$0]  (%p1330_p5), %s923_s17, 512, %s1777_s15, %s894_s16  }
 0x1dd PF: > { %p1047_p1 = scmp.ge.s32.totalorder %s1246_s27, 2  ;;  %s934_s20 = sand.u32 1, %s1234_s24  }
 0x1de   : > { %s935_s9 = scalar_lea.sflag [#allocation3], %s934_s20 }
 0x1df   : > { %p1041_p2 = pnand %p1047_p1, %p1334_p6 }
 0x1e1   : > { %p1042_p3 = pneg %p1041_p2 }
 0x1e3   : > { %1225 = dma.done.wait (%p1042_p3), %s935_s9, 512  }
 0x1e4   : > { %1227 = vsyncadd (%p1042_p3), %s935_s9, 4294966784  ;;  %s944_s21 = scalar_lea.sflag [#allocation5], %s934_s20 }
 0x1e5   : > { %1229 = dma.done.wait (%p1042_p3), %s944_s21, 512  }
 0x1e6   : > { %1231 = vsyncadd (%p1042_p3), %s944_s21, 4294966784  ;;  %p21_p5 = scmp.ge.s32.totalorder %s1317_s30, 4   ;;  %s1849_s24 = smov %s1238_s25 }
 0x1e7   : > { %s1850_s25 = smov %s1242_s26  ;;  %s1851_s26 = smov %s1328_s10 }
 0x1e8   : > { %s1852_s27 = smov %s1317_s30  ;;  %23 = sbr.rel (!%p21_p5) target bundleno = 5 (0x5), region = 97 }
 0x1ed   :  { %949 = vsyncpa [#allocation3], 1 }
 0x1ee   :  { %951 = vsyncpa [#allocation3 + $0x1], 1 }
 0x1ef   :  { %952 = vsyncpa [#allocation5], 1 }
 0x1f0   :  { %954 = vsyncpa [#allocation5 + $0x1], 1 }

</bundles_post_ra>
